<compile_context>
chip_gen: v5e
topology: v5e:2x2
jax: 0.10.0
libtpu: 0.0.40
codegen_flags: <defaults>
</compile_context>

<pallas_src>
import jax
import jax.numpy as jnp
from jax import lax
from jax.experimental import pallas as pl
from jax.experimental.pallas import tpu as pltpu

# Use full-f32 matmuls everywhere (kernel dots and the pure-JAX reference) so the
# correctness check is apples-to-apples.
jax.config.update("jax_default_matmul_precision", "highest")


def _self_attn_kernel(x_ref, w_ref, scale_ref, shift_ref, beta_ref, out_ref):
    """One batch element per grid step. x:(1,Cin,N) w:(Cout,Cin) out:(1,Cout,N)."""
    x = x_ref[0]                      # (C_in, N)
    w = w_ref[...]                    # (C_out, C_in)

    # --- BasicConv1D: 1x1 Conv1d (no bias) -> folded BatchNorm1d -> Mish -----------
    y = jnp.dot(w, x, preferred_element_type=jnp.float32)          # (C_out, N), MXU
    y = y * scale_ref[...] + shift_ref[...]                         # per-channel affine

    # Mish(y) = y * tanh(softplus(y)) = y * t(t+2) / (t(t+2) + 2),  t = exp(y).
    # Single EUP exp; the clamp keeps t finite and the rational form saturates to 1
    # for y > 20 exactly like PyTorch's thresholded softplus + tanh path.
    t = jnp.exp(jnp.minimum(y, 20.0))
    u = t * (t + 2.0)
    q = y * (u / (u + 2.0))                                         # proj_key, (C_out, N)

    # --- energy[i, j] = sum_c q[c, i] * q[c, j]   (proj_query @ proj_key) ----------
    energy = lax.dot_general(q, q, (((0,), (0,)), ((), ())),
                             preferred_element_type=jnp.float32)    # (N, N)

    # --- softmax over the last dim --------------------------------------------------
    m = jnp.max(energy, axis=-1, keepdims=True)
    e = jnp.exp(energy - m)
    attn = e / jnp.sum(e, axis=-1, keepdims=True)                   # (N, N)

    # --- out_x[c, i] = sum_j q[c, j] * attn[i, j]  (proj_key @ attention^T) --------
    out_x = lax.dot_general(q, attn, (((1,), (1,)), ((), ())),
                            preferred_element_type=jnp.float32)     # (C_out, N)

    beta = beta_ref[0]
    out_ref[0] = (beta * out_x + q).astype(out_ref.dtype)


def self_attn(x, conv_w, bn_gamma, bn_beta, bn_mean, bn_var, beta, *, eps=1e-5):
    """Self_Attn forward.  x: (B, C_in, N)  ->  (B, C_out, N)."""
    B, C_in, N = x.shape
    C_out = conv_w.shape[0]

    # TODO(synk): BatchNorm1d is applied in inference mode (running stats folded into a
    # per-channel affine); train-mode batch statistics would need a cross-batch pass.
    scale = (bn_gamma / jnp.sqrt(bn_var + eps)).astype(jnp.float32)
    shift = (bn_beta - bn_mean * scale).astype(jnp.float32)
    scale = scale.reshape(C_out, 1)
    shift = shift.reshape(C_out, 1)
    beta_arr = jnp.asarray(beta, dtype=jnp.float32).reshape(1)

    return pl.pallas_call(
        _self_attn_kernel,
        out_shape=jax.ShapeDtypeStruct((B, C_out, N), x.dtype),
        grid_spec=pltpu.PrefetchScalarGridSpec(
            num_scalar_prefetch=0,
            grid=(B,),
            in_specs=[
                pl.BlockSpec((1, C_in, N), lambda b: (b, 0, 0)),     # x: one batch / step
                pl.BlockSpec((C_out, C_in), lambda b: (0, 0)),       # conv weight (resident)
                pl.BlockSpec((C_out, 1), lambda b: (0, 0)),          # folded BN scale
                pl.BlockSpec((C_out, 1), lambda b: (0, 0)),          # folded BN shift
                pl.BlockSpec(memory_space=pltpu.MemorySpace.SMEM),   # beta scalar
            ],
            out_specs=pl.BlockSpec((1, C_out, N), lambda b: (b, 0, 0)),
        ),
        compiler_params=pltpu.CompilerParams(
            # batches are independent -> shard the grid across TensorCores on v7x
            dimension_semantics=("parallel",),
        ),
    )(x, conv_w, scale, shift, beta_arr)


def _self_attn_ref(x, conv_w, bn_gamma, bn_beta, bn_mean, bn_var, beta, eps=1e-5):
    """Pure-JAX reference matching the PyTorch Self_Attn forward (inference-mode BN)."""
    y = jnp.einsum("oc,bcn->bon", conv_w, x)
    y = (y - bn_mean[None, :, None]) / jnp.sqrt(bn_var[None, :, None] + eps)
    y = bn_gamma[None, :, None] * y + bn_beta[None, :, None]
    q = y * jnp.tanh(jax.nn.softplus(y))                       # proj_key: (B, C_out, N)
    energy = jnp.einsum("bci,bcj->bij", q, q)                  # (B, N, N)
    attn = jax.nn.softmax(energy, axis=-1)
    out_x = jnp.einsum("bcj,bij->bci", q, attn)                # (B, C_out, N)
    return beta * out_x + q


if __name__ == "__main__":
    key = jax.random.PRNGKey(0)
    B, C_in, C_out, N = 2, 8, 4, 16
    ks = jax.random.split(key, 6)

    x = jax.random.normal(ks[0], (B, C_in, N), dtype=jnp.float32)
    conv_w = 0.3 * jax.random.normal(ks[1], (C_out, C_in), dtype=jnp.float32)
    bn_gamma = 1.0 + 0.1 * jax.random.normal(ks[2], (C_out,), dtype=jnp.float32)
    bn_beta = 0.1 * jax.random.normal(ks[3], (C_out,), dtype=jnp.float32)
    bn_mean = 0.1 * jax.random.normal(ks[4], (C_out,), dtype=jnp.float32)
    bn_var = jax.random.uniform(ks[5], (C_out,), dtype=jnp.float32,
                                minval=0.5, maxval=1.5)
    beta = jnp.float32(0.75)  # nn.Parameter (zero at PyTorch init; nonzero to exercise path)

    y = self_attn(x, conv_w, bn_gamma, bn_beta, bn_mean, bn_var, beta)
    y = jax.block_until_ready(y)

    y_ref = _self_attn_ref(x, conv_w, bn_gamma, bn_beta, bn_mean, bn_var, beta)
    assert y.shape == (B, C_out, N) and y.dtype == x.dtype
    assert jnp.allclose(y, y_ref, atol=5e-3, rtol=5e-3), float(jnp.max(jnp.abs(y - y_ref)))

    print("KERNEL_OK")
</pallas_src>

<mosaic_0001>
module attributes {stable_mosaic.version = 11 : i64} {
  func.func @_self_attn_kernel(%arg0: i32, %arg1: memref<1x8x16xf32, #tpu.memory_space<vmem>>, %arg2: memref<4x8xf32, #tpu.memory_space<vmem>>, %arg3: memref<4x1xf32, #tpu.memory_space<vmem>>, %arg4: memref<4x1xf32, #tpu.memory_space<vmem>>, %arg5: memref<1xf32, #tpu.memory_space<smem>>, %arg6: memref<1x4x16xf32, #tpu.memory_space<vmem>>) attributes {dimension_semantics = [#tpu.dimension_semantics<parallel>], iteration_bounds = array<i64: 2>, scalar_prefetch = 0 : i64, scratch_operands = 0 : i64, tpu.core_type = #tpu.core_type<tc>, window_params = [{transform_indices = @transform_0, window_bounds = array<i64: 1, 8, 16>}, {pipeline_mode = #tpu.pipeline_mode<synchronous>, transform_indices = @transform_1, window_bounds = array<i64: 4, 8>}, {pipeline_mode = #tpu.pipeline_mode<synchronous>, transform_indices = @transform_2, window_bounds = array<i64: 4, 1>}, {pipeline_mode = #tpu.pipeline_mode<synchronous>, transform_indices = @transform_3, window_bounds = array<i64: 4, 1>}, {transform_indices = @transform_4, window_bounds = array<i64: 1>}, {transform_indices = @transform_5, window_bounds = array<i64: 1, 4, 16>}]} {
    %c0 = arith.constant 0 : index
    %c0_0 = arith.constant 0 : index
    %c0_1 = arith.constant 0 : index
    %0 = vector.load %arg1[%c0, %c0_0, %c0_1] : memref<1x8x16xf32, #tpu.memory_space<vmem>>, vector<1x8x16xf32>
    %1 = vector.shape_cast %0 : vector<1x8x16xf32> to vector<8x16xf32>
    %c0_2 = arith.constant 0 : index
    %c0_3 = arith.constant 0 : index
    %2 = vector.load %arg2[%c0_2, %c0_3] : memref<4x8xf32, #tpu.memory_space<vmem>>, vector<4x8xf32>
    %cst = arith.constant dense<0.000000e+00> : vector<4x16xf32>
    %3 = tpu.matmul %2, %1, %cst {dimension_numbers = #tpu.dot_dimension_numbers<[1], [0], [0], [1], [0, 0, 1, 1], [], []>, precision = #tpu.contract_precision<fp32>} : vector<4x8xf32>, vector<8x16xf32>, vector<4x16xf32> -> vector<4x16xf32>
    %c0_4 = arith.constant 0 : index
    %c0_5 = arith.constant 0 : index
    %4 = vector.load %arg3[%c0_4, %c0_5] : memref<4x1xf32, #tpu.memory_space<vmem>>, vector<4x1xf32>
    %5 = vector.broadcast %4 : vector<4x1xf32> to vector<4x16xf32>
    %6 = arith.mulf %3, %5 : vector<4x16xf32>
    %c0_6 = arith.constant 0 : index
    %c0_7 = arith.constant 0 : index
    %7 = vector.load %arg4[%c0_6, %c0_7] : memref<4x1xf32, #tpu.memory_space<vmem>>, vector<4x1xf32>
    %8 = vector.broadcast %7 : vector<4x1xf32> to vector<4x16xf32>
    %9 = arith.addf %6, %8 : vector<4x16xf32>
    %cst_8 = arith.constant 2.000000e+01 : f32
    %10 = vector.broadcast %cst_8 : f32 to vector<4x16xf32>
    %11 = arith.minimumf %9, %10 : vector<4x16xf32>
    %12 = math.exp %11 : vector<4x16xf32>
    %cst_9 = arith.constant 2.000000e+00 : f32
    %13 = vector.broadcast %cst_9 : f32 to vector<4x16xf32>
    %14 = arith.addf %12, %13 : vector<4x16xf32>
    %15 = arith.mulf %12, %14 : vector<4x16xf32>
    %cst_10 = arith.constant 2.000000e+00 : f32
    %16 = vector.broadcast %cst_10 : f32 to vector<4x16xf32>
    %17 = arith.addf %15, %16 : vector<4x16xf32>
    %18 = arith.divf %15, %17 : vector<4x16xf32>
    %19 = arith.mulf %9, %18 : vector<4x16xf32>
    %cst_11 = arith.constant dense<0.000000e+00> : vector<16x16xf32>
    %20 = tpu.matmul %19, %19, %cst_11 {dimension_numbers = #tpu.dot_dimension_numbers<[0], [0], [1], [1], [0, 1, 1, 1], [], []>, precision = #tpu.contract_precision<fp32>} : vector<4x16xf32>, vector<4x16xf32>, vector<16x16xf32> -> vector<16x16xf32>
    %cst_12 = arith.constant dense<0xFF800000> : vector<16xf32>
    %21 = vector.multi_reduction <maximumf>, %20, %cst_12 [1] : vector<16x16xf32> to vector<16xf32>
    %22 = vector.shape_cast %21 : vector<16xf32> to vector<16x1xf32>
    %23 = vector.broadcast %22 : vector<16x1xf32> to vector<16x16xf32>
    %24 = arith.subf %20, %23 : vector<16x16xf32>
    %25 = math.exp %24 : vector<16x16xf32>
    %cst_13 = arith.constant dense<0.000000e+00> : vector<16xf32>
    %26 = vector.multi_reduction <add>, %25, %cst_13 [1] : vector<16x16xf32> to vector<16xf32>
    %27 = vector.shape_cast %26 : vector<16xf32> to vector<16x1xf32>
    %28 = vector.broadcast %27 : vector<16x1xf32> to vector<16x16xf32>
    %29 = arith.divf %25, %28 : vector<16x16xf32>
    %cst_14 = arith.constant dense<0.000000e+00> : vector<4x16xf32>
    %30 = tpu.matmul %19, %29, %cst_14 {dimension_numbers = #tpu.dot_dimension_numbers<[1], [1], [0], [0], [0, 0, 1, 0], [], []>, precision = #tpu.contract_precision<fp32>} : vector<4x16xf32>, vector<16x16xf32>, vector<4x16xf32> -> vector<4x16xf32>
    %c0_15 = arith.constant 0 : index
    %31 = memref.load %arg5[%c0_15] : memref<1xf32, #tpu.memory_space<smem>>
    %32 = vector.broadcast %31 : f32 to vector<4x16xf32>
    %33 = arith.mulf %32, %30 : vector<4x16xf32>
    %34 = arith.addf %33, %19 : vector<4x16xf32>
    %c0_16 = arith.constant 0 : index
    %c0_17 = arith.constant 0 : index
    %c0_18 = arith.constant 0 : index
    %35 = vector.load %arg6[%c0_16, %c0_17, %c0_18] : memref<1x4x16xf32, #tpu.memory_space<vmem>>, vector<1x4x16xf32>
    %36 = vector.shape_cast %35 : vector<1x4x16xf32> to vector<4x16xf32>
    %37 = vector.shape_cast %34 : vector<4x16xf32> to vector<1x4x16xf32>
    tpu.vector_store %arg6[%c0_16, %c0_17, %c0_18], %37 {strides = array<i32>} : memref<1x4x16xf32, #tpu.memory_space<vmem>>, vector<1x4x16xf32>,
    return
  }
  func.func @transform_0(%arg0: i32) -> (i32, i32, i32) {
    %c0_i32 = arith.constant 0 : i32
    %c0_i32_0 = arith.constant 0 : i32
    %c0_i32_1 = arith.constant 0 : i32
    return %arg0, %c0_i32, %c0_i32_0 : i32, i32, i32
  }
  func.func @transform_1(%arg0: i32) -> (i32, i32) {
    %c0_i32 = arith.constant 0 : i32
    %c0_i32_0 = arith.constant 0 : i32
    %c0_i32_1 = arith.constant 0 : i32
    return %c0_i32, %c0_i32_0 : i32, i32
  }
  func.func @transform_2(%arg0: i32) -> (i32, i32) {
    %c0_i32 = arith.constant 0 : i32
    %c0_i32_0 = arith.constant 0 : i32
    %c0_i32_1 = arith.constant 0 : i32
    return %c0_i32, %c0_i32_0 : i32, i32
  }
  func.func @transform_3(%arg0: i32) -> (i32, i32) {
    %c0_i32 = arith.constant 0 : i32
    %c0_i32_0 = arith.constant 0 : i32
    %c0_i32_1 = arith.constant 0 : i32
    return %c0_i32, %c0_i32_0 : i32, i32
  }
  func.func @transform_4(%arg0: i32) -> i32 {
    %c0_i32 = arith.constant 0 : i32
    %c0_i32_0 = arith.constant 0 : i32
    return %c0_i32 : i32
  }
  func.func @transform_5(%arg0: i32) -> (i32, i32, i32) {
    %c0_i32 = arith.constant 0 : i32
    %c0_i32_0 = arith.constant 0 : i32
    %c0_i32_1 = arith.constant 0 : i32
    return %arg0, %c0_i32, %c0_i32_0 : i32, i32, i32
  }
}

</mosaic_0001>

<bundles_post_ra>
// kernel: tpu_custom_call.1
= control target key start
LH: loop header
LB: loop body
LE: loop exit
PB: predicated region body
PF: predicated region fallthrough
CT: control target
= control target key end

     0   :  { %s1314_s0 = inlined_call_operand.hbm [shape: f32[2,8,16], index: 0, kind: input, shape index: {}]   ;;  %s1315_s1 = inlined_call_operand.vmem [shape: f32[4,8], index: 1, kind: input, shape index: {}]   ;;  %s1316_s2 = inlined_call_operand.vmem [shape: f32[4,1], index: 2, kind: input, shape index: {}]   ;;  %s1317_s3 = inlined_call_operand.vmem [shape: f32[4,1], index: 3, kind: input, shape index: {}]   ;;  %s1318_s4 = inlined_call_operand.<no memory space> [shape: f32[1], index: 4, kind: input, shape index: {}]   ;;  %s1319_s5 = inlined_call_operand.hbm [shape: f32[2,4,16], index: 5, kind: output, shape index: {}]  }
   0x1   :  { %10 = sst [smem:[#allocation2]] %s1318_s4 }
   0x2   :  { %11 = vsyncpa [#allocation4], 0 }
   0x3   :  { %13 = vsyncpa [#allocation4 + $0x1], 0 }
   0x4   :  { %14 = vsyncpa [#allocation5], 0 }
   0x5   :  { %16 = vsyncpa [#allocation5 + $0x1], 0  ;;  %s1164_s20 = smov 0   ;;  %s1166_s21 = smov 0  }
   0x6   :  { %s1168_s22 = smov 0   ;;  %s1170_s23 = smov 0  }
   0x7 LB: > { %s1185_s4 = sadd.s32 4294967295, %s1128_s23   ;;  %s959_s24 = sadd.s32 4294967294, %s1128_s23   ;;  %s1128_s23 = sphi %s1170_s23, %s1329_s23   ;;  %s1124_s22 = sphi %s1168_s22, %s1328_s22   ;;  %s1120_s21 = sphi %s1166_s21, %s1327_s21   ;;  %s1116_s20 = sphi %s1164_s20, %s1326_s20  }
   0x8   : > { %s1189_s25 = sadd.s32 1, %s1128_s23   ;;  %s29_s26 = sadd.s32 1, %s1124_s22 }
   0x9   : > { %s26_s27 = ssub.s32 %s1128_s23, %s1189_s25  ;;  %p36_p0 = scmp.ne.s32.totalorder %s1124_s22, %s1120_s21 }
   0xa   : > { %p27_p1 = scmp.eq.s32.totalorder %s26_s27, 0  ;;  %p37_p2 = scmp.eq.s32.totalorder %s1128_s23, 0 }
   0xb   : > { %p42_p3 = scmp.ne.s32.totalorder %s1120_s21, %s1116_s20  ;;  %p43_p4 = scmp.eq.s32.totalorder %s1185_s4, 0 }
   0xc   : > { %s1201_s28 = scalar_select %p27_p1, %s1124_s22, %s29_s26  }
   0xd   : > { %p1203_p5 = por %p37_p2, %p36_p0  ;;  %p1207_p6 = por %p43_p4, %p42_p3 }
   0xe   : > { %p150_p7 = scmp.eq.s32.totalorder %s1185_s4, 1  ;;  %p156_p8 = scmp.eq.s32.totalorder %s959_s24, 1 }
   0xf   : > { %p983_p10 = scmp.lt.s32.totalorder %s1128_s23, 2  ;;  %s188_s8 = sand.u32 1, %s1124_s22  }
  0x10   : > { %p1214_p11 = por %p150_p7, %p36_p0  ;;  %p1218_p12 = por %p156_p8, %p42_p3 }
  0x11   : > { %s963_s9 = sshll.u32 %s1128_s23, 3  ;;  %s962_s10 = sshll.u32 %s188_s8, 3 }
  0x12   : > { %s196_s13 = scalar_lea.hbm %s1314_s0, %s963_s9  ;;  %s192_s15 = scalar_lea.vmem [#allocation3], %s962_s10 }
  0x13   : > { %s198_s14 = sshll.u32 %s196_s13, 4  ;;  %s200_s16 = sshll.u32 %s192_s15, 4  ;;  %s199_s14 = int_to_ptr.hbm [resolvable:$true] %s198_s14  ;;  %s201_s16 = int_to_ptr.vmem [resolvable:$true] %s200_s16 }
  0x14   : > { %p1229_p13 = pnand %p983_p10, %p1203_p5  ;;  %p964_p0 = scmp.ge.s32.totalorder %s1128_s23, 1 }
  0x15   : > { %p205_p1 = scmp.lt.s32.totalorder %s1128_s23, 3  ;;  %s189_s18 = scalar_lea.sflag [#allocation4], %s188_s8 }
  0x16   : > { %s1032_s19 = sshra.s32 %s199_s14, 4  ;;  %p1036_p3 = pneg %p1229_p13  ;;  %s1033_s19 = int_to_ptr.hbm [resolvable:$true] %s1032_s19 }
  0x17   : > { %s1034_s24 = scalar_lea.hbm %s1033_s19, 8  ;;  %s1039_s29 = scalar_lea.hbm %s1314_s0, 16 }
  0x18   : > { %p1035_p2 = scmp.ne.s32.totalorder %s1033_s19, %s1034_s24  ;;  %p1040_p5 = scmp.lt.s32.totalorder %s1033_s19, %s1314_s0 }
  0x19   : > { %p1041_p8 = scmp.lt.s32.totalorder %s1039_s29, %s1034_s24 }
  0x1a   : > { %p1037_p4 = pnand %p1036_p3, %p1035_p2 }
  0x1b   : > { %p1042_p10 = por %p1041_p8, %p1040_p5 }
  0x1c   : > { %p1038_p7 = pneg %p1037_p4 }
  0x1e   : > { %p1043_p9 = pnand %p1042_p10, %p1038_p7 }
  0x20   : > { %1046 = shalt.err (!%p1043_p9)
}
  0x21   : > { %978 = dma.hbm_to_vmem [thread:$0]  (!%p1229_p13), %s199_s14, 128, %s201_s16, %s189_s18  }
  0x22   : > { %p206_p2 = pnand %p964_p0, %p205_p1 }
  0x23   : > { %s1250_s8 = sand.u32 (!%p206_p2), 1, %s1120_s21  }
  0x24   : > { %209 = sbr.rel (%p206_p2) target bundleno = 1001 (0x3e9), region = 40  ;;  %s965_s11 = sshll.u32 (!%p206_p2), %s1250_s8, 3 }
  0x25   : > { %s212_s12 = scalar_lea.sflag (!%p206_p2), [#allocation4], %s1250_s8  ;;  %s215_s13 = scalar_lea.vmem (!%p206_p2), [#allocation3], %s965_s11 }
  0x29   : > { %1107 = dma.done.wait (%p1207_p6), %s212_s12, 128  }
  0x2a   : > { %1109 = vsyncadd (%p1207_p6), %s212_s12, 4294967168  ;;  %v1130_v0 = vmov 0   ;;  %vm245_vm0 = vcmask 64512   ;;  %v243_v1 = vld [vmem:[%s215_s13] sm:$0xff]  ;;  %vm470_vm5 = vcmask 1043456   ;;  %vm463_vm6 = vcmask 31744  }
  0x2b   : > { %1019 = vset.pattern.permute.xlu0 %v1130_v0  ;;  %v244_v2 = vld [vmem:[%s1315_s1] sm:$0xf]  ;;  %v264_v4 = vand.u32 4294901760, %v243_v1  ;;  %vm651_vm7 = vcmask 130048   ;;  %s867_s19 = sld [smem:[#allocation2]]  ;;  %s966_s24 = sshll.u32 %s1250_s8, 2 }
  0x2c   : > { %v395_v3 = vld [vmem:[%s1316_s2] sm:$0xf]  ;;  %v247_v5 = vsel %vm245_vm0, %v244_v2, 0  ;;  %s968_s26 = sshll.u32 %s1185_s4, 2  ;;  %s242_s10 = scalar_lea.vmem [#allocation6], %s966_s24  ;;  %vm871_vm0 = vcmask 125952  }
  0x2d   : > { %398 = vperm.xlu0 %1019, %v395_v3   ;;  %v266_v6 = vand.u32 4294901760, %v247_v5  ;;  %v291_v7 = vsub.f32 %v243_v1, %v264_v4  ;;  %341 = vmatpush.msra.mxu3 %v264_v4  ;;  %v402_v11 = vld [vmem:[%s1317_s3] sm:$0xf]  ;;  %s884_s9 = scalar_lea.hbm %s1319_s5, %s968_s26  ;;  %s886_s11 = sshll.u32 %s242_s10, 4  ;;  %s887_s11 = int_to_ptr.vmem [resolvable:$true] %s886_s11 }
  0x2e   : > { %265 = vmatpush.msra.mxu0 %v264_v4  ;;  %s888_s12 = sshll.u32 %s884_s9, 4  ;;  %s874_s4 = scalar_lea.sflag [#allocation5], %s1250_s8  ;;  %s889_s12 = int_to_ptr.hbm [resolvable:$true] %s888_s12 }
  0x2f   : > { %v267_v8 = vsub.f32 %v247_v5, %v266_v6  ;;  %318 = vmatpush.msra.mxu2 %v291_v7  ;;  %v292_v9 = vand.u32 4294901760, %v291_v7  ;;  %s1076_s13 = sshra.s32 %s889_s12, 4  ;;  %s1082_s17 = scalar_lea.hbm %s1319_s5, 8  ;;  %s1077_s13 = int_to_ptr.hbm [resolvable:$true] %s1076_s13 }
  0x30   : > { %s1078_s14 = scalar_lea.hbm %s1077_s13, 4  ;;  %p1083_p0 = scmp.lt.s32.totalorder %s1077_s13, %s1319_s5 }
  0x31   : > { %321 = vmatmul.f32.vlgmr.msra.gmra.mxu2 %v267_v8  ;;  %v268_v10 = vand.u32 4294901760, %v267_v8  ;;  %v293_v12 = vsub.f32 %v291_v7, %v292_v9  ;;  %367 = vmatpush.msrb.mxu0 %v292_v9  ;;  %p1079_p6 = scmp.ne.s32.totalorder %s1077_s13, %s1078_s14  ;;  %p1084_p1 = scmp.lt.s32.totalorder %s1082_s17, %s1078_s14 }
  0x33   : > { %345 = vmatmul.f32.vlgmr.msra.gmra.mxu3 %v268_v10  ;;  %v269_v13 = vsub.f32 %v267_v8, %v268_v10  ;;  %v294_v14 = vand.u32 4294901760, %v293_v12  ;;  %p1080_p9 = pnand %p1079_p6, %p1214_p11  ;;  %p1085_p3 = por %p1084_p1, %p1083_p0 }
  0x35   : > { %405 = vperm.xlu0 %1019, %v402_v11   ;;  %v270_v15 = vand.u32 4294901760, %v269_v13  ;;  %295 = vmatpush.msra.mxu1 %v294_v14  ;;  %p1081_p13 = pneg %p1080_p9 }
  0x36   : > { %297 = vmatmul.f32.vlgmr.msra.gmra.mxu1 %v266_v6 }
  0x37   : > { %271 = vmatmul.f32.vlgmr.msra.gmra.mxu0 %v270_v15  ;;  %389 = vmatpush.msrb.mxu1 %v264_v4  ;;  %p1086_p4 = pnand %p1085_p3, %p1081_p13 }
  0x3e   : > { %391 = vmatmul.f32.vlgmr.msrb.gmra.mxu1 %v266_v6 }
  0x3f   : > { %369 = vmatmul.f32.vlgmr.msrb.gmra.mxu0 %v266_v6 }
  0x9f   : > { %v399_v21 = vpop.permute.xlu0 %398 }
  0xa7   : > { %v406_v29 = vpop.permute.xlu0 %405 }
  0xb3   : > { %v298_v17 = vpop.f32.mrf.mxu1 }
  0xb4   : > { %v272_v16 = vpop.f32.mrf.mxu0  ;;  %v322_v19 = vpop.f32.mrf.mxu2 }
  0xb5   : > { %v299_v18 = vadd.f32 %v298_v17, %v272_v16 }
  0xb6   : > { %v346_v22 = vpop.f32.mrf.mxu3 }
  0xb7   : > { %v323_v20 = vadd.f32 %v322_v19, %v299_v18 }
  0xb9   : > { %v347_v23 = vadd.f32 %v346_v22, %v323_v20 }
  0xbb   : > { %v392_v25 = vpop.f32.mrf.mxu1 }
  0xbc   : > { %v370_v24 = vpop.f32.mrf.mxu0 }
  0xbd   : > { %v371_v26 = vadd.f32 %v370_v24, %v347_v23 }
  0xbf   : > { %v393_v27 = vadd.f32 %v392_v25, %v371_v26 }
  0xc1   : > { %v401_v28 = vmul.f32 %v399_v21, %v393_v27 }
  0xc3   : > { %v408_v30 = vadd.f32 %v406_v29, %v401_v28 }
  0xc5   : > { %v409_v31 = vmin.f32 %v408_v30, 20.0 }
  0xc7   : > { %v410_v32 = vmul.f32 1.442695, %v409_v31 }
  0xc9   : > { %1020 = vpow2.f32 %v410_v32 }
  0xcf   : > { %v1021_v33 = vpop.eup %1020 }
  0xd0   : > { %v412_v34 = vadd.f32 2.0, %v1021_v33 }
  0xd2   : > { %v413_v35 = vmul.f32 %v1021_v33, %v412_v34 }
  0xd4   : > { %v414_v36 = vadd.f32 2.0, %v413_v35 }
  0xd6   : > { %1022 = vrcp.f32 %v414_v36  ;;  %v426_v40 = vand.u32 2147483648, %v414_v36  ;;  %v424_v42 = vand.u32 2147483647, %v414_v36  ;;  %vm420_vm2 = vweird.f32 %v414_v36 }
  0xd8   : > { %v427_v44 = vor.u32 1.1754944e-38, %v426_v40  ;;  %vm425_vm4 = vcmp.eq.f32.partialorder %v424_v42, 8.507059e+37 }
  0xdc   : > { %v1023_v37 = vpop.eup %1022 }
  0xdd   : > { %v416_v38 = vmul.f32 %v1023_v37, %v414_v36  ;;  %vm421_vm1 = vweird.f32 %v1023_v37 }
  0xde   : > { %vm422_vm3 = vmor %vm420_vm2, %vm421_vm1 }
  0xdf   : > { %v417_v39 = vsub.f32 1.0, %v416_v38 }
  0xe1   : > { %v418_v41 = vmul.f32 %v1023_v37, %v417_v39 }
  0xe3   : > { %v419_v43 = vadd.f32 %v1023_v37, %v418_v41 }
  0xe5   : > { %v423_v45 = vsel %vm422_vm3, %v1023_v37, %v419_v43 }
  0xe6   : > { %v428_v46 = vsel %vm425_vm4, %v427_v44, %v423_v45 }
  0xe7   : > { %v429_v47 = vmul.f32 %v428_v46, %v413_v35 }
  0xe9   : > { %v1267_v48 = vmul.f32 %v429_v47, %v408_v30 }
  0xeb   : > { %431 = vxpose.xlu1.b32.start.end [1/1] (short) (narrow) %v1267_v48, 16  ;;  %v472_v49 = vsel %vm470_vm5, %v1267_v48, 0 }
  0xec   : > { %v489_v50 = vand.u32 4294901760, %v472_v49 }
  0xee   : > { %490 = vmatpush.msrb.mxu2 %v489_v50  ;;  %583 = vmatpush.msra.mxu1 %v489_v50  ;;  %v524_v51 = vsub.f32 %v472_v49, %v489_v50 }
  0xf0   : > { %555 = vmatpush.msra.mxu0 %v524_v51  ;;  %v525_v52 = vand.u32 4294901760, %v524_v51 }
  0xf2   : > { %615 = vmatpush.msra.mxu2 %v525_v52  ;;  %v526_v53 = vsub.f32 %v524_v51, %v525_v52 }
  0xf4   : > { %v527_v54 = vand.u32 4294901760, %v526_v53 }
  0xf6   : > { %528 = vmatpush.msrb.mxu3 %v527_v54  ;;  %v700_v54 = vsel %vm651_vm7, %v1267_v48, 0 }
  0xf8   : > { %641 = vmatpush.msra.mxu3 %v489_v50 }
 0x18f   : > { %v447_v55 = vpop.trf.xlu1 }
 0x190   : > { %v465_v56 = vsel %vm463_vm6, %v447_v55, 0 }
 0x191   : > { %v491_v57 = vand.u32 4294901760, %v465_v56 }
 0x193   : > { %v492_v58 = vsub.f32 %v465_v56, %v491_v57  ;;  %530 = vmatmul.f32.vlgmr.msrb.gmra.mxu3 %v491_v57 }
 0x195   : > { %v493_v59 = vand.u32 4294901760, %v492_v58  ;;  %558 = vmatmul.f32.vlgmr.msra.gmra.mxu0 %v492_v58 }
 0x197   : > { %v448_v60 = vpop.trf.xlu1  ;;  %587 = vmatmul.f32.vlgmr.msra.gmra.mxu1 %v493_v59  ;;  %v494_v61 = vsub.f32 %v492_v58, %v493_v59 }
 0x198   : > { %v468_v62 = vsel %vm463_vm6, %v448_v60, 0  ;;  %v726_v60 = vand.u32 4294901760, %v700_v54 }
 0x199   : > { %v499_v63 = vand.u32 4294901760, %v468_v62  ;;  %v495_v0 = vand.u32 4294901760, %v494_v61 }
 0x19b   : > { %v500_v1 = vsub.f32 %v468_v62, %v499_v63  ;;  %496 = vmatmul.f32.vlgmr.msrb.gmra.mxu2 %v495_v0  ;;  %534 = vmatmul.f32.gmra.mxu3 %v499_v63 }
 0x19d   : > { %563 = vmatmul.f32.gmra.mxu0 %v500_v1  ;;  %v501_v2 = vand.u32 4294901760, %v500_v1 }
 0x19f   : > { %593 = vmatmul.f32.gmra.mxu1 %v501_v2  ;;  %v502_v3 = vsub.f32 %v500_v1, %v501_v2  ;;  %v727_v1 = vsub.f32 %v700_v54, %v726_v60 }
 0x1a1   : > { %v503_v4 = vand.u32 4294901760, %v502_v3 }
 0x1a3   : > { %504 = vmatmul.f32.gmra.mxu2 %v503_v4  ;;  %643 = vmatmul.f32.vlgmr.msra.gmra.mxu3 %v491_v57 }
 0x1ab   : > { %617 = vmatmul.f32.vlgmr.msra.gmra.mxu2 %v491_v57  ;;  %647 = vmatmul.f32.gmra.mxu3 %v499_v63 }
 0x1b3   : > { %621 = vmatmul.f32.gmra.mxu2 %v499_v63 }
 0x212   : > { %v559_v9 = vpop.f32.mrf.mxu0 }
 0x214   : > { %v588_v12 = vpop.f32.mrf.mxu1 }
 0x216   : > { %v531_v5 = vpop.f32.mrf.mxu3 }
 0x21a   : > { %v564_v18 = vpop.f32.mrf.mxu0 }
 0x21c   : > { %v594_v22 = vpop.f32.mrf.mxu1 }
 0x21e   : > { %v497_v6 = vpop.f32.mrf.mxu2  ;;  %v535_v7 = vpop.f32.mrf.mxu3 }
 0x21f   : > { %v532_v8 = vadd.f32 %v531_v5, %v497_v6  ;;  %v728_v6 = vand.u32 4294901760, %v727_v1 }
 0x221   : > { %v560_v11 = vadd.f32 %v559_v9, %v532_v8 }
 0x223   : > { %v589_v14 = vadd.f32 %v588_v12, %v560_v11 }
 0x226   : > { %v505_v10 = vpop.f32.mrf.mxu2  ;;  %v644_v15 = vpop.f32.mrf.mxu3 }
 0x227   : > { %v536_v13 = vadd.f32 %v535_v7, %v505_v10  ;;  %v729_v10 = vsub.f32 %v727_v1, %v728_v6 }
 0x229   : > { %v565_v19 = vadd.f32 %v564_v18, %v536_v13 }
 0x22b   : > { %v595_v23 = vadd.f32 %v594_v22, %v565_v19 }
 0x22e   : > { %v618_v16 = vpop.f32.mrf.mxu2  ;;  %v648_v26 = vpop.f32.mrf.mxu3 }
 0x22f   : > { %v619_v17 = vadd.f32 %v618_v16, %v589_v14  ;;  %v730_v14 = vand.u32 4294901760, %v729_v10 }
 0x231   : > { %v645_v20 = vadd.f32 %v644_v15, %v619_v17 }
 0x233   : > { %v652_v21 = vsel %vm651_vm7, %v645_v20, -inf }
 0x234   : > { %653 = vmax.xlane.f32.xlu2 %v652_v21 }
 0x236   : > { %v622_v24 = vpop.f32.mrf.mxu2 }
 0x237   : > { %v623_v25 = vadd.f32 %v622_v24, %v595_v23 }
 0x239   : > { %v649_v27 = vadd.f32 %v648_v26, %v623_v25 }
 0x23b   : > { %v655_v28 = vsel %vm651_vm7, %v649_v27, -inf }
 0x23c   : > { %656 = vmax.xlane.f32.xlu1 %v655_v28  ;;  %v868_v28 = vstv %s867_s19 }
 0x2a7   : > { %v654_v29 = vpop.xlane.xlu2 %653 }
 0x2a8   : > { %v658_v30 = vsub.f32 %v645_v20, %v654_v29 }
 0x2aa   : > { %v660_v31 = vmul.f32 1.442695, %v658_v30 }
 0x2ac   : > { %1024 = vpow2.f32 %v660_v31 }
 0x2af   : > { %v657_v32 = vpop.xlane.xlu1 %656 }
 0x2b0   : > { %v659_v33 = vsub.f32 %v649_v27, %v657_v32 }
 0x2b2   : > { %v1025_v34 = vpop.eup %1024  ;;  %v662_v35 = vmul.f32 1.442695, %v659_v33 }
 0x2b3   : > { %v664_v36 = vsel %vm651_vm7, %v1025_v34, 0.0 }
 0x2b4   : > { %1026 = vpow2.f32 %v662_v35  ;;  %665 = vadd.xlane.f32.xlu0 %v664_v36 }
 0x2ba   : > { %v1027_v37 = vpop.eup %1026 }
 0x2bb   : > { %v667_v38 = vsel %vm651_vm7, %v1027_v37, 0.0 }
 0x2bc   : > { %668 = vadd.xlane.f32.xlu2 %v667_v38 }
 0x327   : > { %v666_v39 = vpop.xlane.xlu0 %665 }
 0x328   : > { %1028 = vrcp.f32 %v666_v39  ;;  %v681_v44 = vand.u32 2147483648, %v666_v39  ;;  %v679_v46 = vand.u32 2147483647, %v666_v39  ;;  %vm675_vm9 = vweird.f32 %v666_v39 }
 0x32a   : > { %v682_v50 = vor.u32 1.1754944e-38, %v681_v44  ;;  %vm680_vm11 = vcmp.eq.f32.partialorder %v679_v46, 8.507059e+37 }
 0x32e   : > { %v1029_v40 = vpop.eup %1028 }
 0x32f   : > { %v671_v41 = vmul.f32 %v1029_v40, %v666_v39  ;;  %v669_v42 = vpop.xlane.xlu2 %668  ;;  %vm676_vm8 = vweird.f32 %v1029_v40 }
 0x330   : > { %1030 = vrcp.f32 %v669_v42  ;;  %vm677_vm10 = vmor %vm675_vm9, %vm676_vm8  ;;  %v696_v57 = vand.u32 2147483648, %v669_v42  ;;  %v694_v59 = vand.u32 2147483647, %v669_v42  ;;  %vm690_vm13 = vweird.f32 %v669_v42 }
 0x331   : > { %v672_v43 = vsub.f32 1.0, %v671_v41 }
 0x332   : > { %v697_v63 = vor.u32 1.1754944e-38, %v696_v57  ;;  %vm695_vm15 = vcmp.eq.f32.partialorder %v694_v59, 8.507059e+37 }
 0x333   : > { %v673_v45 = vmul.f32 %v1029_v40, %v672_v43 }
 0x335   : > { %v674_v47 = vadd.f32 %v1029_v40, %v673_v45 }
 0x336   : > { %v1031_v49 = vpop.eup %1030 }
 0x337   : > { %v678_v51 = vsel %vm677_vm10, %v1029_v40, %v674_v47  ;;  %v686_v52 = vmul.f32 %v1031_v49, %v669_v42  ;;  %vm691_vm12 = vweird.f32 %v1031_v49 }
 0x338   : > { %v683_v53 = vsel %vm680_vm11, %v682_v50, %v678_v51  ;;  %vm692_vm14 = vmor %vm690_vm13, %vm691_vm12 }
 0x339   : > { %v684_v55 = vmul.f32 %v1025_v34, %v683_v53  ;;  %v687_v56 = vsub.f32 1.0, %v686_v52 }
 0x33b   : > { %v688_v58 = vmul.f32 %v1031_v49, %v687_v56  ;;  %v703_v62 = vsel %vm651_vm7, %v684_v55, 0 }
 0x33c   : > { %v724_v3 = vand.u32 4294901760, %v703_v62 }
 0x33d   : > { %v689_v61 = vadd.f32 %v1031_v49, %v688_v58 }
 0x33e   : > { %v756_v8 = vsub.f32 %v703_v62, %v724_v3 }
 0x33f   : > { %v693_v0 = vsel %vm692_vm14, %v1031_v49, %v689_v61 }
 0x340   : > { %v698_v2 = vsel %vm695_vm15, %v697_v63, %v693_v0  ;;  %v757_v12 = vand.u32 4294901760, %v756_v8 }
 0x341   : > { %v699_v4 = vmul.f32 %v1027_v37, %v698_v2 }
 0x342   : > { %v758_v16 = vsub.f32 %v756_v8, %v757_v12 }
 0x343   : > { %v706_v5 = vsel %vm651_vm7, %v699_v4, 0 }
 0x344   : > { %v722_v7 = vand.u32 4294901760, %v706_v5  ;;  %v759_v17 = vand.u32 4294901760, %v758_v16 }
 0x346   : > { %723 = vmatpush.xpose.msrb.mxu0 %v722_v7  ;;  %v750_v9 = vsub.f32 %v706_v5, %v722_v7  ;;  %859 = vmatpush.xpose.msrb.mxu3 %v722_v7 }
 0x348   : > { %v751_v11 = vand.u32 4294901760, %v750_v9 }
 0x34a   : > { %725 = vmatpush.xpose.msrb.mxu0 %v724_v3  ;;  %834 = vmatpush.xpose.msrb.mxu2 %v751_v11  ;;  %v752_v13 = vsub.f32 %v750_v9, %v751_v11 }
 0x34b   : > { %861 = vmatpush.xpose.msrb.mxu3 %v724_v3 }
 0x34c   : > { %v753_v15 = vand.u32 4294901760, %v752_v13 }
 0x34d   : > { %731 = vmatmul.f32.vlgmr.msrb.gmra.mxu0 %v730_v14 }
 0x34e   : > { %782 = vmatpush.xpose.msra.mxu0 %v750_v9  ;;  %863 = vmatmul.f32.vlgmr.msrb.gmra.mxu3 %v726_v60 }
 0x34f   : > { %754 = vmatpush.xpose.msrb.mxu1 %v753_v15  ;;  %838 = vmatpush.xpose.msrb.mxu2 %v757_v12 }
 0x352   : > { %785 = vmatpush.xpose.msra.mxu0 %v756_v8  ;;  %840 = vmatmul.f32.vlgmr.msrb.gmra.mxu2 %v726_v60 }
 0x353   : > { %760 = vmatpush.xpose.msrb.mxu1 %v759_v17 }
 0x355   : > { %788 = vmatmul.f32.vlgmr.msra.gmra.mxu0 %v727_v1 }
 0x356   : > { %762 = vmatmul.f32.vlgmr.msrb.gmra.mxu1 %v726_v60 }
 0x357   : > { %807 = vmatpush.xpose.msra.mxu1 %v722_v7 }
 0x35b   : > { %809 = vmatpush.xpose.msra.mxu1 %v724_v3 }
 0x35e   : > { %813 = vmatmul.f32.vlgmr.msra.gmra.mxu1 %v728_v6 }
 0x3ca   : > { %v732_v18 = vpop.f32.mrf.mxu0 }
 0x3d1   : > { %v864_v27 = vpop.f32.mrf.mxu3 }
 0x3d2   : > { %v789_v21 = vpop.f32.mrf.mxu0 }
 0x3d3   : > { %v763_v19 = vpop.f32.mrf.mxu1 }
 0x3d4   : > { %v764_v20 = vadd.f32 %v763_v19, %v732_v18 }
 0x3d5   : > { %v841_v25 = vpop.f32.mrf.mxu2 }
 0x3d6   : > { %v790_v22 = vadd.f32 %v789_v21, %v764_v20 }
 0x3db   : > { %v814_v23 = vpop.f32.mrf.mxu1 }
 0x3dc   : > { %v815_v24 = vadd.f32 %v814_v23, %v790_v22 }
 0x3de   : > { %v842_v26 = vadd.f32 %v841_v25, %v815_v24 }
 0x3e0   : > { %v865_v29 = vadd.f32 %v864_v27, %v842_v26 }
 0x3e2   : > { %v869_v30 = vmul.f32 %v868_v28, %v865_v29 }
 0x3e4   : > { %v870_v31 = vadd.f32 %v869_v30, %v1267_v48 }
 0x3e6   : > { %872 = vst.msk [vmem:[%s242_s10] sm:$0xf] %vm871_vm0, %v870_v31 }
 0x3e7   : > { %1089 = shalt.err (!%p1086_p4)
}
 0x3e8   : > { %973 = dma.vmem_to_hbm [thread:$0]  (%p1214_p11), %s887_s11, 64, %s889_s12, %s874_s4  }
 0x3e9 PF: > { %s900_s8 = sand.u32 1, %s1116_s20   ;;  %p1325_p7 = scmp.ge.s32.totalorder %s1128_s23, 2 }
 0x3ea   : > { %s901_s19 = scalar_lea.sflag [#allocation5], %s900_s8 }
 0x3eb   : > { %p980_p5 = pnand %p1325_p7, %p1218_p12 }
 0x3ed   : > { %p981_p8 = pneg %p980_p5 }
 0x3ef   : > { %1111 = dma.done.wait (%p981_p8), %s901_s19, 64  }
 0x3f0   : > { %1113 = vsyncadd (%p981_p8), %s901_s19, 4294967232  ;;  %p19_p10 = scmp.ge.s32.totalorder %s1189_s25, 4   ;;  %s1326_s20 = smov %s1120_s21 }
 0x3f1   : > { %s1327_s21 = smov %s1124_s22  ;;  %s1328_s22 = smov %s1201_s28 }
 0x3f2   : > { %s1329_s23 = smov %s1189_s25  ;;  %21 = sbr.rel (!%p19_p10) target bundleno = 7 (0x7), region = 85 }
 0x3f7   :  { %907 = vsyncpa [#allocation4], 1 }
 0x3f8   :  { %909 = vsyncpa [#allocation4 + $0x1], 1 }
 0x3f9   :  { %910 = vsyncpa [#allocation5], 1 }
 0x3fa   :  { %912 = vsyncpa [#allocation5 + $0x1], 1 }

</bundles_post_ra>
